<compile_context>
chip_gen: v7x
topology: tpu7x:2x2x1
jax: 0.10.0
libtpu: 0.0.40
codegen_flags: <defaults>
</compile_context>

<pallas_src>
import jax
import jax.numpy as jnp
from jax.experimental import pallas as pl
from jax.experimental.pallas import tpu as pltpu


def _round_up(n: int, m: int) -> int:
    return ((n + m - 1) // m) * m


def mlp_kernel(x_ref, w1_ref, b1_ref, w2_ref, b2_ref, o_ref):
    # Hidden layer: bf16 x @ bf16 W1 -> f32 acc (MXU), bias + ReLU in f32 (VPU).
    h = jnp.dot(x_ref[...], w1_ref[...], preferred_element_type=jnp.float32)
    h = jnp.maximum(h + b1_ref[...], 0.0)
    # Output layer: cast hidden back to bf16 for the MXU, accumulate in f32.
    y = jnp.dot(h.astype(w2_ref.dtype), w2_ref[...],
                preferred_element_type=jnp.float32)
    o_ref[...] = (y + b2_ref[...]).astype(o_ref.dtype)


def net_forward(x, w1, b1, w2, b2, *, block_m: int = 256):
    """x: (B, F) f32, w1: (F, H), b1: (1, H), w2: (H, O), b2: (1, O) -> (B, O) f32.

    block_m: batch tile (MXU-native 256 on v6e/v7x; shrinks automatically for
    small batches). Weights stay resident in VMEM across all batch tiles.
    """
    B, F = x.shape
    H = w1.shape[1]
    O = w2.shape[1]

    # Lane-dense output: pad O up to a multiple of 128 (unmasked stores).
    O_pad = _round_up(max(O, 128), 128)
    # Batch tile: multiple of 8 (sublane), capped at block_m.
    tm = min(block_m, _round_up(B, 8))
    B_pad = _round_up(B, tm)

    # bf16 matmul operands (f32 accumulation happens inside the kernel).
    xb = x.astype(jnp.bfloat16)
    if B_pad != B:
        xb = jnp.pad(xb, ((0, B_pad - B), (0, 0)))
    w1b = w1.astype(jnp.bfloat16)
    w2b = jnp.pad(w2, ((0, 0), (0, O_pad - O))).astype(jnp.bfloat16)
    b1f = b1.astype(jnp.float32)
    b2f = jnp.pad(b2.astype(jnp.float32), ((0, 0), (0, O_pad - O)))

    grid = (B_pad // tm,)
    out = pl.pallas_call(
        mlp_kernel,
        out_shape=jax.ShapeDtypeStruct((B_pad, O_pad), jnp.float32),
        grid=grid,
        in_specs=[
            # x: tiled along batch; prefetched tile i+1 while computing tile i.
            pl.BlockSpec((tm, F), lambda i: (i, 0)),
            # weights / biases: same block every step -> VMEM-resident.
            pl.BlockSpec((F, H), lambda i: (0, 0)),
            pl.BlockSpec((1, H), lambda i: (0, 0)),
            pl.BlockSpec((H, O_pad), lambda i: (0, 0)),
            pl.BlockSpec((1, O_pad), lambda i: (0, 0)),
        ],
        out_specs=pl.BlockSpec((tm, O_pad), lambda i: (i, 0)),
        compiler_params=pltpu.CompilerParams(
            # Batch tiles are independent: shard across both TCs on v7x.
            dimension_semantics=("parallel",),
            # Shapes here are tiny; raise vmem_limit_bytes only if the MLP is
            # scaled up (and re-derive tiles for v7x's 64 MiB VMEM).
        ),
    )(xb, w1b, b1f, w2b, b2f)
    return out[:B, :O]


def reference_forward(x, w1, b1, w2, b2):
    # Reference with the same bf16 matmul / f32-accumulate recipe.
    h = jnp.dot(x.astype(jnp.bfloat16), w1.astype(jnp.bfloat16),
                preferred_element_type=jnp.float32)
    h = jnp.maximum(h + b1, 0.0)
    y = jnp.dot(h.astype(jnp.bfloat16), w2.astype(jnp.bfloat16),
                preferred_element_type=jnp.float32)
    return y + b2


if __name__ == "__main__":
    # Small shapes consistent with Net(n_feature, n_hidden, n_output).
    batch, n_feature, n_hidden, n_output = 8, 32, 32, 4

    key = jax.random.PRNGKey(0)
    k_x, k_w1, k_b1, k_w2, k_b2, k_big = jax.random.split(key, 6)

    # Deterministic synthetic parameters (Kaiming-ish uniform like nn.Linear).
    x = jax.random.normal(k_x, (batch, n_feature), dtype=jnp.float32)
    s1 = 1.0 / jnp.sqrt(n_feature)
    w1 = jax.random.uniform(k_w1, (n_feature, n_hidden), jnp.float32, -s1, s1)
    b1 = jax.random.uniform(k_b1, (1, n_hidden), jnp.float32, -s1, s1)
    s2 = 1.0 / jnp.sqrt(n_hidden)
    w2 = jax.random.uniform(k_w2, (n_hidden, n_output), jnp.float32, -s2, s2)
    b2 = jax.random.uniform(k_b2, (1, n_output), jnp.float32, -s2, s2)

    # Tiny-batch path (grid of 1, tm = 8).
    out = jax.block_until_ready(net_forward(x, w1, b1, w2, b2))
    ref = reference_forward(x, w1, b1, w2, b2)
    assert out.shape == (batch, n_output)
    assert jnp.allclose(out, ref, atol=1e-3, rtol=1e-3)

    # Larger-batch path exercising the tiled grid (2 x 256-row tiles, padding,
    # weight residency) — this is where the per-call overhead amortizes.
    big_batch = 500  # deliberately not a multiple of the tile
    xb = jax.random.normal(k_big, (big_batch, n_feature), dtype=jnp.float32)
    out_b = jax.block_until_ready(net_forward(xb, w1, b1, w2, b2))
    ref_b = reference_forward(xb, w1, b1, w2, b2)
    assert out_b.shape == (big_batch, n_output)
    assert jnp.allclose(out_b, ref_b, atol=1e-3, rtol=1e-3)

    # TODO(synk): Net.predict (jieba/TF-IDF/sklearn text preprocessing +
    # CrossEntropyLoss thresholding) is host-side Python glue with no Pallas
    # equivalent; only the forward() hot path is implemented as a kernel.
    print("KERNEL_OK")
</pallas_src>

<mosaic_0001>
module attributes {stable_mosaic.version = 11 : i64} {
  func.func @mlp_kernel(%arg0: i32, %arg1: memref<8x32xbf16, #tpu.memory_space<vmem>>, %arg2: memref<32x32xbf16, #tpu.memory_space<vmem>>, %arg3: memref<1x32xf32, #tpu.memory_space<vmem>>, %arg4: memref<32x128xbf16, #tpu.memory_space<vmem>>, %arg5: memref<1x128xf32, #tpu.memory_space<vmem>>, %arg6: memref<8x128xf32, #tpu.memory_space<vmem>>) attributes {dimension_semantics = [#tpu.dimension_semantics<parallel>], iteration_bounds = array<i64: 1>, scalar_prefetch = 0 : i64, scratch_operands = 0 : i64, tpu.core_type = #tpu.core_type<tc>, window_params = [{transform_indices = @transform_0, window_bounds = array<i64: 8, 32>}, {pipeline_mode = #tpu.pipeline_mode<synchronous>, transform_indices = @transform_1, window_bounds = array<i64: 32, 32>}, {pipeline_mode = #tpu.pipeline_mode<synchronous>, transform_indices = @transform_2, window_bounds = array<i64: 1, 32>}, {pipeline_mode = #tpu.pipeline_mode<synchronous>, transform_indices = @transform_3, window_bounds = array<i64: 32, 128>}, {pipeline_mode = #tpu.pipeline_mode<synchronous>, transform_indices = @transform_4, window_bounds = array<i64: 1, 128>}, {transform_indices = @transform_5, window_bounds = array<i64: 8, 128>}]} {
    %c0 = arith.constant 0 : index
    %c0_0 = arith.constant 0 : index
    %0 = vector.load %arg1[%c0, %c0_0] : memref<8x32xbf16, #tpu.memory_space<vmem>>, vector<8x32xbf16>
    %c0_1 = arith.constant 0 : index
    %c0_2 = arith.constant 0 : index
    %1 = vector.load %arg2[%c0_1, %c0_2] : memref<32x32xbf16, #tpu.memory_space<vmem>>, vector<32x32xbf16>
    %cst = arith.constant dense<0.000000e+00> : vector<8x32xf32>
    %2 = tpu.matmul %0, %1, %cst {dimension_numbers = #tpu.dot_dimension_numbers<[1], [0], [0], [1], [0, 0, 1, 1], [], []>} : vector<8x32xbf16>, vector<32x32xbf16>, vector<8x32xf32> -> vector<8x32xf32>
    %c0_3 = arith.constant 0 : index
    %c0_4 = arith.constant 0 : index
    %3 = vector.load %arg3[%c0_3, %c0_4] : memref<1x32xf32, #tpu.memory_space<vmem>>, vector<1x32xf32>
    %4 = vector.broadcast %3 : vector<1x32xf32> to vector<8x32xf32>
    %5 = arith.addf %2, %4 : vector<8x32xf32>
    %cst_5 = arith.constant 0.000000e+00 : f32
    %6 = vector.broadcast %cst_5 : f32 to vector<8x32xf32>
    %7 = arith.maximumf %5, %6 : vector<8x32xf32>
    %8 = arith.truncf %7 : vector<8x32xf32> to vector<8x32xbf16>
    %c0_6 = arith.constant 0 : index
    %c0_7 = arith.constant 0 : index
    %9 = vector.load %arg4[%c0_6, %c0_7] : memref<32x128xbf16, #tpu.memory_space<vmem>>, vector<32x128xbf16>
    %cst_8 = arith.constant dense<0.000000e+00> : vector<8x128xf32>
    %10 = tpu.matmul %8, %9, %cst_8 {dimension_numbers = #tpu.dot_dimension_numbers<[1], [0], [0], [1], [0, 0, 1, 1], [], []>} : vector<8x32xbf16>, vector<32x128xbf16>, vector<8x128xf32> -> vector<8x128xf32>
    %c0_9 = arith.constant 0 : index
    %c0_10 = arith.constant 0 : index
    %11 = vector.load %arg5[%c0_9, %c0_10] : memref<1x128xf32, #tpu.memory_space<vmem>>, vector<1x128xf32>
    %12 = vector.broadcast %11 : vector<1x128xf32> to vector<8x128xf32>
    %13 = arith.addf %10, %12 : vector<8x128xf32>
    %c0_11 = arith.constant 0 : index
    %c0_12 = arith.constant 0 : index
    %14 = vector.load %arg6[%c0_11, %c0_12] : memref<8x128xf32, #tpu.memory_space<vmem>>, vector<8x128xf32>
    tpu.vector_store %arg6[%c0_11, %c0_12], %13 {strides = array<i32>} : memref<8x128xf32, #tpu.memory_space<vmem>>, vector<8x128xf32>,
    return
  }
  func.func @transform_0(%arg0: i32) -> (i32, i32) {
    %c0_i32 = arith.constant 0 : i32
    %c0_i32_0 = arith.constant 0 : i32
    return %arg0, %c0_i32 : i32, i32
  }
  func.func @transform_1(%arg0: i32) -> (i32, i32) {
    %c0_i32 = arith.constant 0 : i32
    %c0_i32_0 = arith.constant 0 : i32
    %c0_i32_1 = arith.constant 0 : i32
    return %c0_i32, %c0_i32_0 : i32, i32
  }
  func.func @transform_2(%arg0: i32) -> (i32, i32) {
    %c0_i32 = arith.constant 0 : i32
    %c0_i32_0 = arith.constant 0 : i32
    %c0_i32_1 = arith.constant 0 : i32
    return %c0_i32, %c0_i32_0 : i32, i32
  }
  func.func @transform_3(%arg0: i32) -> (i32, i32) {
    %c0_i32 = arith.constant 0 : i32
    %c0_i32_0 = arith.constant 0 : i32
    %c0_i32_1 = arith.constant 0 : i32
    return %c0_i32, %c0_i32_0 : i32, i32
  }
  func.func @transform_4(%arg0: i32) -> (i32, i32) {
    %c0_i32 = arith.constant 0 : i32
    %c0_i32_0 = arith.constant 0 : i32
    %c0_i32_1 = arith.constant 0 : i32
    return %c0_i32, %c0_i32_0 : i32, i32
  }
  func.func @transform_5(%arg0: i32) -> (i32, i32) {
    %c0_i32 = arith.constant 0 : i32
    %c0_i32_0 = arith.constant 0 : i32
    return %arg0, %c0_i32 : i32, i32
  }
}

</mosaic_0001>

<bundles_post_ra>
// kernel: tpu_custom_call.1
= control target key start
LH: loop header
LB: loop body
LE: loop exit
PB: predicated region body
PF: predicated region fallthrough
CT: control target
= control target key end

     0   :  { %10 = vsyncpa [#allocation3], 0  ;;  %s448_s0 = inlined_call_operand.hbm [shape: bf16[8,32], index: 0, kind: input, shape index: {}]   ;;  %s449_s1 = inlined_call_operand.hbm [shape: bf16[32,32], index: 1, kind: input, shape index: {}]   ;;  %s450_s2 = inlined_call_operand.vmem [shape: f32[1,32], index: 2, kind: input, shape index: {}]   ;;  %s451_s3 = inlined_call_operand.hbm [shape: bf16[32,128], index: 3, kind: input, shape index: {}]   ;;  %s452_s4 = inlined_call_operand.vmem [shape: f32[1,128], index: 4, kind: input, shape index: {}]   ;;  %s453_s5 = inlined_call_operand.hbm [shape: f32[8,128], index: 5, kind: output, shape index: {}]  }
   0x1   :  { %11 = vsyncpa [#allocation6], 0 }
   0x2   :  { %12 = vsyncpa [#allocation4], 0  ;;  %s350_s18 = smov [#allocation5]   ;;  %s256_s22 = scalar_lea.hbm %s449_s1, 256 }
   0x3   :  { %s28_s19 = sshll.u32 %s350_s18, 4  ;;  %p257_p0 = scmp.ne.s32.totalorder %s449_s1, %s256_s22  ;;  %s29_s19 = int_to_ptr.vmem [resolvable:$true] %s28_s19 }
   0x4   :  { %p260_p1 = scmp.lt.u32.totalorder %s256_s22, %s449_s1 }
   0x6   :  { %p262_p2 = pnand %p260_p1, %p257_p0 }
   0x8   :  { %265 = shalt.err (!%p262_p2)
}
   0x9   :  { %s266_s27 = scalar_lea.vmem %s29_s19, 256  ;;  %p271_p4 = scmp.lt.s32.totalorder %s29_s19, %s29_s19 }
   0xa   :  { %p267_p3 = scmp.ne.s32.totalorder %s29_s19, %s266_s27  ;;  %p272_p5 = scmp.lt.s32.totalorder %s266_s27, %s266_s27 }
   0xc   :  { %p273_p6 = por %p272_p5, %p271_p4 }
   0xe   :  { %p274_p7 = pnand %p273_p6, %p267_p3 }
  0x10   :  { %277 = shalt.err (!%p274_p7)
}
  0x11   :  { %s351_s28 = smov 64   ;;  %s352_s29 = smov 4  }
  0x12   :  { %34 = dma.hbm_to_vmem [thread:$0]  %s449_s1, 256, %s29_s19, [#allocation6], %s351_s28, %s351_s28, %s352_s29  }
  0x13   :  { %s353_s7 = smov [#allocation2]   ;;  %s354_s9 = smov [#allocation7]  }
  0x14   :  { %s19_s8 = sshll.u32 %s353_s7, 4  ;;  %s42_s10 = sshll.u32 %s354_s9, 4  ;;  %s20_s8 = int_to_ptr.vmem [resolvable:$true] %s19_s8  ;;  %s43_s10 = int_to_ptr.vmem [resolvable:$true] %s42_s10 }
  0x15   :  { %s278_s13 = scalar_lea.hbm %s448_s0, 64 }
  0x16   :  { %p279_p8 = scmp.ne.s32.totalorder %s448_s0, %s278_s13  ;;  %p282_p9 = scmp.lt.u32.totalorder %s278_s13, %s448_s0 }
  0x18   :  { %p284_p10 = pnand %p282_p9, %p279_p8 }
  0x1a   :  { %287 = shalt.err (!%p284_p10)
}
  0x1b   :  { %s288_s1 = scalar_lea.vmem %s20_s8, 64  ;;  %p293_p12 = scmp.lt.s32.totalorder %s20_s8, %s20_s8 }
  0x1c   :  { %p289_p11 = scmp.ne.s32.totalorder %s20_s8, %s288_s1  ;;  %p294_p13 = scmp.lt.s32.totalorder %s288_s1, %s288_s1 }
  0x1e   :  { %p295_p0 = por %p294_p13, %p293_p12 }
  0x20   :  { %p296_p1 = pnand %p295_p0, %p289_p11 }
  0x22   :  { %299 = shalt.err (!%p296_p1)
}
  0x23   :  { %22 = dma.hbm_to_vmem [thread:$0]  %s448_s0, 64, %s20_s8, [#allocation3]  }
  0x24   :  { %s300_s22 = scalar_lea.hbm %s451_s3, 256 }
  0x25   :  { %p301_p2 = scmp.ne.s32.totalorder %s451_s3, %s300_s22  ;;  %p304_p3 = scmp.lt.u32.totalorder %s300_s22, %s451_s3 }
  0x27   :  { %p306_p4 = pnand %p304_p3, %p301_p2 }
  0x29   :  { %309 = shalt.err (!%p306_p4)
}
  0x2a   :  { %s310_s27 = scalar_lea.vmem %s43_s10, 256  ;;  %p315_p6 = scmp.lt.s32.totalorder %s43_s10, %s43_s10 }
  0x2b   :  { %p311_p5 = scmp.ne.s32.totalorder %s43_s10, %s310_s27  ;;  %p316_p7 = scmp.lt.s32.totalorder %s310_s27, %s310_s27 }
  0x2d   :  { %p317_p8 = por %p316_p7, %p315_p6 }
  0x2f   :  { %p318_p9 = pnand %p317_p8, %p311_p5 }
  0x31   :  { %321 = shalt.err (!%p318_p9)
}
  0x32   :  { %48 = dma.hbm_to_vmem [thread:$0]  %s451_s3, 256, %s43_s10, [#allocation6], %s351_s28, %s351_s28, %s352_s29  }
  0x33   :  { %344 = dma.done.wait [#allocation3], 64  }
  0x34   :  { %345 = vsyncadd [#allocation3], 4294967232 }
  0x35   :  { %346 = dma.done.wait [#allocation6], 512  }
  0x36   :  { %347 = vsyncadd [#allocation6], 4294966784  ;;  %v355_v0 = vmov 0.0   ;;  %vm356_vm0 = vmmov 0   ;;  %v252_v1 = vld [vmem:[#allocation5] sm:$0xff]   ;;  %v253_v2 = vld [vmem:[#allocation5 + $0x8] sm:$0xff]  }
  0x37   :  { %228 = vmatprep.subr.bf16.mxu0 %v355_v0  ;;  %232 = vmatprep.mubr.msk.bf16.mxu0 %vm356_vm0, %v355_v0  ;;  %v61_v3 = vld [vmem:[#allocation2] sm:$0xf]  ;;  %vm85_vm1 = vcmask 261120   ;;  %v254_v4 = vld [vmem:[#allocation7] sm:$0xff]   ;;  %s357_s7 = smov [#allocation8]  }
  0x38   :  { %236 = vmatprep.subr.bf16.mxu1 %v355_v0  ;;  %240 = vmatprep.mubr.msk.bf16.mxu1 %vm356_vm0, %v355_v0  ;;  %v255_v5 = vld [vmem:[#allocation7 + $0x8] sm:$0xff]   ;;  %s204_s8 = sshll.u32 %s357_s7, 4  ;;  %s205_s8 = int_to_ptr.vmem [resolvable:$true] %s204_s8 }
  0x39   :  { %229 = vmatpush3.bf16.msra.mxu0 %v252_v1  ;;  %237 = vmatpush3.bf16.msra.mxu1 %v254_v4  ;;  %v214_v6 = vld [vmem:[%s450_s2] ss:$0 sm:$0xff]  ;;  %s322_s2 = scalar_lea.vmem %s205_s8, 128  ;;  %p327_p11 = scmp.lt.s32.totalorder %s205_s8, %s205_s8 }
  0x3a   :  { %230 = vmatprep.subr.bf16.mxu0 %v355_v0  ;;  %238 = vmatprep.subr.bf16.mxu1 %v355_v0  ;;  %v218_v14 = vld [vmem:[%s452_s4] ss:$0 sm:$0xff]  ;;  %p323_p10 = scmp.ne.s32.totalorder %s205_s8, %s322_s2  ;;  %p328_p12 = scmp.lt.s32.totalorder %s322_s2, %s322_s2 }
  0x3c   :  { %p329_p13 = por %p328_p12, %p327_p11 }
  0x3d   :  { %231 = vmatpush3.bf16.msra.mxu0 %v253_v2  ;;  %239 = vmatpush3.bf16.msra.mxu1 %v255_v5 }
  0x3e   :  { %p330_p0 = pnand %p329_p13, %p323_p10 }
  0x40   :  { %233 = vmatmul.mubr.msk.bf16.vlgmr.msra.gmra.mrb[0].mxu0 %vm85_vm1, %v61_v3 }
 0x113   :  { %v123_v7 = vpop.f32.mrb[0].mxu0 }
 0x114   :  { %v124_v8 = vadd.f32 %v214_v6, %v123_v7  ;;  %v234_v9 = vpop.f32.mrb[1].mxu0 }
 0x115   :  { %v126_v10 = vpop.f32.mrb[2].mxu0 }
 0x116   :  { %v129_v11 = vmax.f32 %v124_v8, 0.0  ;;  %v235_v12 = vpop.f32.mrb[3].mxu0 }
 0x118   :  { %v130_v13 = vpack.c.bf16 %v129_v11, %v129_v11 }
 0x11a   :  { %241 = vmatmul.mubr.msk.bf16.vlgmr.msra.gmra.mrb[0].mxu1 %vm85_vm1, %v130_v13 }
 0x1ed   :  { %v191_v15 = vpop.f32.mrb[0].mxu1 }
 0x1ee   :  { %v192_v16 = vadd.f32 %v218_v14, %v191_v15  ;;  %v242_v17 = vpop.f32.mrb[1].mxu1 }
 0x1ef   :  { %v194_v18 = vpop.f32.mrb[2].mxu1 }
 0x1f0   :  { %197 = vst [vmem:[#allocation8] sm:$0xff] %v192_v16  ;;  %v243_v19 = vpop.f32.mrb[3].mxu1 }
 0x1f1   :  { %333 = shalt.err (!%p330_p0)
}
 0x1f2   :  { %s334_s4 = scalar_lea.hbm %s453_s5, 128 }
 0x1f3   :  { %p335_p1 = scmp.ne.s32.totalorder %s453_s5, %s334_s4  ;;  %p338_p2 = scmp.lt.u32.totalorder %s334_s4, %s453_s5 }
 0x1f5   :  { %p340_p3 = pnand %p338_p2, %p335_p1 }
 0x1f7   :  { %343 = shalt.err (!%p340_p3)
}
 0x1f8   :  { %207 = dma.vmem_to_hbm [thread:$0]  %s205_s8, 128, %s453_s5, [#allocation4]  }
 0x1f9   :  { %348 = dma.done.wait [#allocation4], 128  }
 0x1fa   :  { %349 = vsyncadd [#allocation4], 4294967168 }
 0x1fb   :  { %211 = vsyncpa [#allocation3], 1 }
 0x1fc   :  { %212 = vsyncpa [#allocation6], 1 }
 0x1fd   :  { %213 = vsyncpa [#allocation4], 1 }

</bundles_post_ra>
